<compile_context>
chip_gen: v7x
topology: tpu7x:2x2x1
jax: 0.10.0
libtpu: 0.0.40
codegen_flags: <defaults>
</compile_context>

<pallas_src>
import functools

import jax
import jax.numpy as jnp
from jax.experimental import pallas as pl
from jax.experimental.pallas import tpu as pltpu

EPS = 1e-5      # nn.BatchNorm1d default eps
LANE = 128
SUBLANE = 8


def _round_up(v, m):
    return (v + m - 1) // m * m


def _pad2d(a, rows, cols):
    r, c = a.shape
    if r == rows and c == cols:
        return a
    return jnp.pad(a, ((0, rows - r), (0, cols - c)))


# ---------------------------------------------------------------------------
# Pass 1: per-feature sum and sum-of-squares of h = x @ W1 + b1 over the batch.
# Grid over batch tiles ('arbitrary'); outputs are (1, Hp) accumulators mapped
# to the same block every step. Padded rows are masked via an MXU mask-row dot.
# ---------------------------------------------------------------------------
def _stats_kernel(x_ref, w1_ref, b1_ref, sum_ref, sumsq_ref, *, n_rows, tm):
    i = pl.program_id(0)

    @pl.when(i == 0)
    def _():
        sum_ref[...] = jnp.zeros_like(sum_ref)
        sumsq_ref[...] = jnp.zeros_like(sumsq_ref)

    # Operands stay in the input dtype; accumulate in f32 on the MXU.
    h = jnp.dot(x_ref[...], w1_ref[...], preferred_element_type=jnp.float32)
    h = h + b1_ref[...].astype(jnp.float32)

    # Mask padded batch rows; column reductions go through the MXU
    # (mask row @ h) instead of sublane-axis XLU reductions.
    row_ids = jax.lax.broadcasted_iota(jnp.int32, (1, tm), 1) + i * tm
    mask = (row_ids < n_rows).astype(jnp.float32)                 # (1, tm)
    sum_ref[...] += jnp.dot(mask, h, preferred_element_type=jnp.float32)
    sumsq_ref[...] += jnp.dot(mask, h * h, preferred_element_type=jnp.float32)


# ---------------------------------------------------------------------------
# Pass 2: recompute h, finalize BN in-kernel (scale/shift from sum/sumsq),
# apply normalize + ReLU, second matmul. Grid over batch tiles ('parallel').
# The (1, Hp) finalize math is recomputed per tile: negligible EUP/VPU work,
# and it stays correct when the grid is megacore-sharded.
# ---------------------------------------------------------------------------
def _fwd_kernel(x_ref, w1_ref, b1_ref, gamma_ref, beta_ref, sum_ref, sumsq_ref,
                w2_ref, b2_ref, o_ref, *, inv_n):
    mean = sum_ref[...] * inv_n
    var = jnp.maximum(sumsq_ref[...] * inv_n - mean * mean, 0.0)  # biased var
    rstd = jax.lax.rsqrt(var + EPS)
    scale = gamma_ref[...] * rstd
    shift = beta_ref[...] - mean * scale

    h = jnp.dot(x_ref[...], w1_ref[...], preferred_element_type=jnp.float32)
    h = h + b1_ref[...].astype(jnp.float32)
    h = h * scale + shift                            # BatchNorm (affine folded)
    h = jnp.maximum(h, 0.0)                          # ReLU
    out = jnp.dot(h.astype(w2_ref.dtype), w2_ref[...],
                  preferred_element_type=jnp.float32)
    out = out + b2_ref[...].astype(jnp.float32)
    o_ref[...] = out.astype(o_ref.dtype)


def mlp_forward(x, w1, b1, gamma, beta, w2, b2, *, tm_max=512):
    n, hiddim = x.shape
    outdim = w2.shape[1]
    dt = x.dtype

    # Lane-dense feature/output dims; batch padded to a multiple of the tile.
    hp = _round_up(hiddim, LANE)
    op = _round_up(outdim, LANE)
    tm = _round_up(min(tm_max, _round_up(n, SUBLANE)), SUBLANE)
    n_pad = _round_up(n, tm)
    grid = (n_pad // tm,)

    x_p = _pad2d(x, n_pad, hp)
    w1_p = _pad2d(w1, hp, hp).astype(dt)
    b1_p = _pad2d(b1, 1, hp).astype(dt)
    gamma_p = _pad2d(gamma.astype(jnp.float32), 1, hp)
    beta_p = _pad2d(beta.astype(jnp.float32), 1, hp)
    w2_p = _pad2d(w2, hp, op).astype(dt)
    b2_p = _pad2d(b2, 1, op).astype(dt)

    x_spec = pl.BlockSpec((tm, hp), lambda i: (i, 0))

    def resident(shape):
        # Whole array, same block every grid step -> stays in VMEM.
        return pl.BlockSpec(shape, lambda i: (0,) * len(shape))

    itemsize = jnp.dtype(dt).itemsize

    def vmem_limit(resident_bytes, tile_bytes):
        # double-buffered batch tiles + resident weights + headroom; cap so the
        # request fits v7x's 64 MiB per-TC VMEM.
        total = 2 * tile_bytes + resident_bytes + (4 << 20)
        return int(min(max(total, 16 << 20), 48 << 20))

    # ---- pass 1: BN statistics across the whole (padded) batch ----
    p1_resident = (hp * hp + hp) * itemsize + 2 * hp * 4
    p1_tiles = tm * hp * itemsize
    ssum, ssq = pl.pallas_call(
        functools.partial(_stats_kernel, n_rows=n, tm=tm),
        out_shape=(jax.ShapeDtypeStruct((1, hp), jnp.float32),
                   jax.ShapeDtypeStruct((1, hp), jnp.float32)),
        grid=grid,
        in_specs=[x_spec, resident((hp, hp)), resident((1, hp))],
        out_specs=(resident((1, hp)), resident((1, hp))),
        compiler_params=pltpu.CompilerParams(
            dimension_semantics=("arbitrary",),
            vmem_limit_bytes=vmem_limit(p1_resident, p1_tiles)),
    )(x_p, w1_p, b1_p)

    # ---- pass 2: BN finalize + normalize + ReLU + second matmul ----
    p2_resident = ((hp * hp + hp + hp * op + op) * itemsize + 4 * hp * 4)
    p2_tiles = (tm * hp + tm * op) * itemsize
    out_p = pl.pallas_call(
        functools.partial(_fwd_kernel, inv_n=float(1.0 / n)),
        out_shape=jax.ShapeDtypeStruct((n_pad, op), dt),
        grid=grid,
        in_specs=[x_spec,
                  resident((hp, hp)), resident((1, hp)),
                  resident((1, hp)), resident((1, hp)),
                  resident((1, hp)), resident((1, hp)),
                  resident((hp, op)), resident((1, op))],
        out_specs=pl.BlockSpec((tm, op), lambda i: (i, 0)),
        compiler_params=pltpu.CompilerParams(
            dimension_semantics=("parallel",),
            vmem_limit_bytes=vmem_limit(p2_resident, p2_tiles)),
    )(x_p, w1_p, b1_p, gamma_p, beta_p, ssum, ssq, w2_p, b2_p)

    return out_p[:n, :outdim]


def reference_forward(x, w1, b1, gamma, beta, w2, b2):
    h = x @ w1 + b1
    mean = h.mean(axis=0, keepdims=True)
    var = ((h - mean) ** 2).mean(axis=0, keepdims=True)   # biased (train-mode)
    h = (h - mean) / jnp.sqrt(var + EPS) * gamma + beta
    h = jnp.maximum(h, 0.0)
    return h @ w2 + b2


if __name__ == "__main__":
    hiddim, outdim, batch = 32, 16, 50   # batch not a multiple of the tile

    key = jax.random.PRNGKey(0)
    kx, kw1, kb1, kw2, kb2 = jax.random.split(key, 5)

    x = jax.random.normal(kx, (batch, hiddim), dtype=jnp.float32)

    # Deterministic PyTorch-style init: U(-1/sqrt(fan_in), 1/sqrt(fan_in)).
    bound1 = 1.0 / jnp.sqrt(jnp.float32(hiddim))
    w1 = jax.random.uniform(kw1, (hiddim, hiddim), jnp.float32, -bound1, bound1)
    b1 = jax.random.uniform(kb1, (1, hiddim), jnp.float32, -bound1, bound1)
    gamma = jnp.ones((1, hiddim), jnp.float32)   # BN affine defaults
    beta = jnp.zeros((1, hiddim), jnp.float32)
    bound2 = 1.0 / jnp.sqrt(jnp.float32(hiddim))
    w2 = jax.random.uniform(kw2, (hiddim, outdim), jnp.float32, -bound2, bound2)
    b2 = jax.random.uniform(kb2, (1, outdim), jnp.float32, -bound2, bound2)

    # Small tm exercises the multi-tile grid + cross-tile BN accumulation
    # (real workloads should use the default tm_max=512).
    out = mlp_forward(x, w1, b1, gamma, beta, w2, b2, tm_max=16)
    out = jax.block_until_ready(out)

    ref = reference_forward(x, w1, b1, gamma, beta, w2, b2)
    assert out.shape == (batch, outdim)
    assert jnp.allclose(out, ref, atol=2e-4, rtol=2e-4), "mismatch vs JAX reference"

    # TODO(synk): dropout (dp>0) omitted — config uses dp=0 (eval/no-dropout path).
    # TODO(synk): BN running_mean/running_var momentum update not materialized
    #             (forward-only kernel; train-mode batch stats are used).
    print("KERNEL_OK")
</pallas_src>

<mosaic_0001>
module attributes {stable_mosaic.version = 11 : i64} {
  func.func @_stats_kernel(%arg0: i32, %arg1: memref<16x128xf32, #tpu.memory_space<vmem>>, %arg2: memref<128x128xf32, #tpu.memory_space<vmem>>, %arg3: memref<1x128xf32, #tpu.memory_space<vmem>>, %arg4: memref<1x128xf32, #tpu.memory_space<vmem>>, %arg5: memref<1x128xf32, #tpu.memory_space<vmem>>) attributes {dimension_semantics = [#tpu.dimension_semantics<arbitrary>], iteration_bounds = array<i64: 4>, scalar_prefetch = 0 : i64, scratch_operands = 0 : i64, tpu.core_type = #tpu.core_type<tc>, window_params = [{transform_indices = @transform_0, window_bounds = array<i64: 16, 128>}, {pipeline_mode = #tpu.pipeline_mode<synchronous>, transform_indices = @transform_1, window_bounds = array<i64: 128, 128>}, {pipeline_mode = #tpu.pipeline_mode<synchronous>, transform_indices = @transform_2, window_bounds = array<i64: 1, 128>}, {pipeline_mode = #tpu.pipeline_mode<synchronous>, transform_indices = @transform_3, window_bounds = array<i64: 1, 128>}, {pipeline_mode = #tpu.pipeline_mode<synchronous>, transform_indices = @transform_4, window_bounds = array<i64: 1, 128>}]} {
    %c0_i32 = arith.constant 0 : i32
    %0 = arith.cmpi eq, %arg0, %c0_i32 : i32
    %1 = arith.extui %0 : i1 to i32
    %c0_i32_0 = arith.constant 0 : i32
    %2 = arith.cmpi ne, %1, %c0_i32_0 : i32
    scf.if %2 {
      %cst_16 = arith.constant 0.000000e+00 : f32
      %26 = vector.broadcast %cst_16 : f32 to vector<1x128xf32>
      %c0_17 = arith.constant 0 : index
      %c0_18 = arith.constant 0 : index
      %27 = vector.load %arg4[%c0_17, %c0_18] : memref<1x128xf32, #tpu.memory_space<vmem>>, vector<1x128xf32>
      tpu.vector_store %arg4[%c0_17, %c0_18], %26 {strides = array<i32>} : memref<1x128xf32, #tpu.memory_space<vmem>>, vector<1x128xf32>,
      %cst_19 = arith.constant 0.000000e+00 : f32
      %28 = vector.broadcast %cst_19 : f32 to vector<1x128xf32>
      %c0_20 = arith.constant 0 : index
      %c0_21 = arith.constant 0 : index
      %29 = vector.load %arg5[%c0_20, %c0_21] : memref<1x128xf32, #tpu.memory_space<vmem>>, vector<1x128xf32>
      tpu.vector_store %arg5[%c0_20, %c0_21], %28 {strides = array<i32>} : memref<1x128xf32, #tpu.memory_space<vmem>>, vector<1x128xf32>,
    } else {
    }
    %c0 = arith.constant 0 : index
    %c0_1 = arith.constant 0 : index
    %3 = vector.load %arg1[%c0, %c0_1] : memref<16x128xf32, #tpu.memory_space<vmem>>, vector<16x128xf32>
    %c0_2 = arith.constant 0 : index
    %c0_3 = arith.constant 0 : index
    %4 = vector.load %arg2[%c0_2, %c0_3] : memref<128x128xf32, #tpu.memory_space<vmem>>, vector<128x128xf32>
    %cst = arith.constant dense<0.000000e+00> : vector<16x128xf32>
    %5 = tpu.matmul %3, %4, %cst {dimension_numbers = #tpu.dot_dimension_numbers<[1], [0], [0], [1], [0, 0, 1, 1], [], []>} : vector<16x128xf32>, vector<128x128xf32>, vector<16x128xf32> -> vector<16x128xf32>
    %c0_4 = arith.constant 0 : index
    %c0_5 = arith.constant 0 : index
    %6 = vector.load %arg3[%c0_4, %c0_5] : memref<1x128xf32, #tpu.memory_space<vmem>>, vector<1x128xf32>
    %7 = vector.broadcast %6 : vector<1x128xf32> to vector<16x128xf32>
    %8 = arith.addf %5, %7 : vector<16x128xf32>
    %9 = tpu.iota {dimensions = array<i32: 1>} : vector<1x16xi32>
    %c16_i32 = arith.constant 16 : i32
    %10 = arith.muli %arg0, %c16_i32 : i32
    %11 = vector.broadcast %10 : i32 to vector<1x16xi32>
    %12 = arith.addi %9, %11 : vector<1x16xi32>
    %c50_i32 = arith.constant 50 : i32
    %13 = vector.broadcast %c50_i32 : i32 to vector<1x16xi32>
    %14 = arith.cmpi slt, %12, %13 : vector<1x16xi32>
    %15 = arith.extui %14 : vector<1x16xi1> to vector<1x16xi32>
    %16 = arith.sitofp %15 : vector<1x16xi32> to vector<1x16xf32>
    %c0_6 = arith.constant 0 : index
    %c0_7 = arith.constant 0 : index
    %17 = vector.load %arg4[%c0_6, %c0_7] : memref<1x128xf32, #tpu.memory_space<vmem>>, vector<1x128xf32>
    %cst_8 = arith.constant dense<0.000000e+00> : vector<1x128xf32>
    %18 = tpu.matmul %16, %8, %cst_8 {dimension_numbers = #tpu.dot_dimension_numbers<[1], [0], [0], [1], [0, 0, 1, 1], [], []>} : vector<1x16xf32>, vector<16x128xf32>, vector<1x128xf32> -> vector<1x128xf32>
    %19 = arith.addf %17, %18 : vector<1x128xf32>
    %c0_9 = arith.constant 0 : index
    %c0_10 = arith.constant 0 : index
    %20 = vector.load %arg4[%c0_9, %c0_10] : memref<1x128xf32, #tpu.memory_space<vmem>>, vector<1x128xf32>
    tpu.vector_store %arg4[%c0_9, %c0_10], %19 {strides = array<i32>} : memref<1x128xf32, #tpu.memory_space<vmem>>, vector<1x128xf32>,
    %c0_11 = arith.constant 0 : index
    %c0_12 = arith.constant 0 : index
    %21 = vector.load %arg5[%c0_11, %c0_12] : memref<1x128xf32, #tpu.memory_space<vmem>>, vector<1x128xf32>
    %22 = arith.mulf %8, %8 : vector<16x128xf32>
    %cst_13 = arith.constant dense<0.000000e+00> : vector<1x128xf32>
    %23 = tpu.matmul %16, %22, %cst_13 {dimension_numbers = #tpu.dot_dimension_numbers<[1], [0], [0], [1], [0, 0, 1, 1], [], []>} : vector<1x16xf32>, vector<16x128xf32>, vector<1x128xf32> -> vector<1x128xf32>
    %24 = arith.addf %21, %23 : vector<1x128xf32>
    %c0_14 = arith.constant 0 : index
    %c0_15 = arith.constant 0 : index
    %25 = vector.load %arg5[%c0_14, %c0_15] : memref<1x128xf32, #tpu.memory_space<vmem>>, vector<1x128xf32>
    tpu.vector_store %arg5[%c0_14, %c0_15], %24 {strides = array<i32>} : memref<1x128xf32, #tpu.memory_space<vmem>>, vector<1x128xf32>,
    return
  }
  func.func @transform_0(%arg0: i32) -> (i32, i32) {
    %c0_i32 = arith.constant 0 : i32
    %c0_i32_0 = arith.constant 0 : i32
    return %arg0, %c0_i32 : i32, i32
  }
  func.func @transform_1(%arg0: i32) -> (i32, i32) {
    %c0_i32 = arith.constant 0 : i32
    %c0_i32_0 = arith.constant 0 : i32
    %c0_i32_1 = arith.constant 0 : i32
    return %c0_i32, %c0_i32_0 : i32, i32
  }
  func.func @transform_2(%arg0: i32) -> (i32, i32) {
    %c0_i32 = arith.constant 0 : i32
    %c0_i32_0 = arith.constant 0 : i32
    %c0_i32_1 = arith.constant 0 : i32
    return %c0_i32, %c0_i32_0 : i32, i32
  }
  func.func @transform_3(%arg0: i32) -> (i32, i32) {
    %c0_i32 = arith.constant 0 : i32
    %c0_i32_0 = arith.constant 0 : i32
    %c0_i32_1 = arith.constant 0 : i32
    return %c0_i32, %c0_i32_0 : i32, i32
  }
  func.func @transform_4(%arg0: i32) -> (i32, i32) {
    %c0_i32 = arith.constant 0 : i32
    %c0_i32_0 = arith.constant 0 : i32
    %c0_i32_1 = arith.constant 0 : i32
    return %c0_i32, %c0_i32_0 : i32, i32
  }
}

</mosaic_0001>

<bundles_post_ra>
// kernel: tpu_custom_call.1
= control target key start
LH: loop header
LB: loop body
LE: loop exit
PB: predicated region body
PF: predicated region fallthrough
CT: control target
= control target key end

     0   :  { %10 = vsyncpa [#allocation3], 0  ;;  %s1175_s0 = inlined_call_operand.hbm [shape: f32[64,128], index: 0, kind: input, shape index: {}]   ;;  %s1176_s1 = inlined_call_operand.hbm [shape: f32[128,128], index: 1, kind: input, shape index: {}]   ;;  %s1177_s2 = inlined_call_operand.vmem [shape: f32[1,128], index: 2, kind: input, shape index: {}]   ;;  %s1178_s3 = inlined_call_operand.hbm [shape: f32[1,128], index: 3, kind: output, shape index: {0}]   ;;  %s1179_s4 = inlined_call_operand.hbm [shape: f32[1,128], index: 4, kind: output, shape index: {1}]  }
   0x1   :  { %12 = vsyncpa [#allocation3 + $0x1], 0 }
   0x2   :  { %13 = vsyncpa [#allocation6], 0 }
   0x3   :  { %14 = vsyncpa [#allocation4], 0 }
   0x4   :  { %15 = vsyncpa [#allocation9], 0  ;;  %s971_s15 = smov 0   ;;  %s973_s16 = smov 0  }
   0x5   :  { %s975_s17 = smov 0   ;;  %s977_s18 = smov 0  }
   0x6 LB: > { %s990_s19 = sadd.s32 4294967295, %s934_s18   ;;  %p41_p0 = scmp.ne.s32.totalorder %s926_s16, %s922_s15  ;;  %s934_s18 = sphi %s977_s18, %s1195_s18   ;;  %s930_s17 = sphi %s975_s17, %s1194_s17   ;;  %s926_s16 = sphi %s973_s16, %s1193_s16   ;;  %s922_s15 = sphi %s971_s15, %s1192_s15  }
   0x7   : > { %p1180_p1 = scmp.eq.s32.totalorder %s990_s19, 0  ;;  %p575_p2 = scmp.ge.s32.totalorder %s934_s18, 1 }
   0x8   : > { %p136_p3 = scmp.lt.s32.totalorder %s934_s18, 5  ;;  %s936_s22 = smov [#allocation5]  }
   0x9   : > { %p999_p5 = por %p1180_p1, %p41_p0  ;;  %s148_s23 = sshll.u32 %s936_s22, 4  ;;  %s149_s23 = int_to_ptr.vmem [resolvable:$true] %s148_s23 }
   0xa   : > { %p1003_p6 = pnand %p575_p2, %p136_p3  ;;  %s1016_s25 = sadd.s32 1, %s934_s18  }
   0xb   : > { %s1183_s20 = scalar_select %p999_p5, 1, 0 }
   0xc   : > { %s1184_s21 = scalar_select %p1003_p6, 1, 0 }
   0xd   : > { %p722_p7 = pneg %p1003_p6  ;;  %s28_s26 = sadd.s32 1, %s930_s17 }
   0xe   : > { %s25_s27 = ssub.s32 %s934_s18, %s1016_s25  ;;  %s778_s30 = scalar_lea.hbm %s1176_s1, 2048 }
   0xf   : > { %p1011_p8 = pnand %p722_p7, %p1180_p1  ;;  %p779_p9 = scmp.ne.s32.totalorder %s1176_s1, %s778_s30 }
  0x10   : > { %p785_p13 = scmp.lt.u32.totalorder %s778_s30, %s1176_s1 }
  0x11   : > { %p780_p10 = pneg %p1011_p8 }
  0x13   : > { %p781_p11 = pnand %p780_p10, %p779_p9 }
  0x15   : > { %p782_p12 = pneg %p781_p11 }
  0x17   : > { %p787_p0 = pnand %p785_p13, %p782_p12 }
  0x19   : > { %790 = shalt.err (!%p787_p0)
}
  0x1a   : > { %s791_s9 = scalar_lea.vmem %s149_s23, 2048  ;;  %p799_p4 = scmp.lt.s32.totalorder %s149_s23, %s149_s23 }
  0x1b   : > { %p792_p2 = scmp.ne.s32.totalorder %s149_s23, %s791_s9  ;;  %p800_p1 = scmp.lt.s32.totalorder %s791_s9, %s791_s9 }
  0x1d   : > { %p794_p3 = pnand %p792_p2, %p780_p10  ;;  %p801_p5 = por %p800_p1, %p799_p4 }
  0x1f   : > { %p795_p7 = pneg %p794_p3 }
  0x21   : > { %p802_p6 = pnand %p801_p5, %p795_p7 }
  0x23   : > { %805 = shalt.err (!%p802_p6)
}
  0x24   : > { %s937_s10 = smov 128   ;;  %s938_s11 = smov 8  }
  0x25   : > { %725 = dma.hbm_to_vmem [thread:$0]  (!%p1011_p8), %s1176_s1, 2048, %s149_s23, [#allocation6], %s937_s10, %s937_s10, %s938_s11  }
  0x26   : > { %p26_p1 = scmp.eq.s32.totalorder %s25_s27, 0  ;;  %p35_p4 = scmp.ne.s32.totalorder %s930_s17, %s926_s16 }
  0x27   : > { %p36_p5 = scmp.eq.s32.totalorder %s934_s18, 0  ;;  %p731_p6 = scmp.lt.s32.totalorder %s934_s18, 4 }
  0x28   : > { %s1045_s14 = scalar_select %p26_p1, %s930_s17, %s28_s26  }
  0x29   : > { %p37_p9 = por %p36_p5, %p35_p4  ;;  %s165_s15 = sand.u32 1, %s930_s17  }
  0x2a   : > { %s578_s22 = sshll.u32 %s165_s15, 4  ;;  %s596_s28 = sshll.u32 %s934_s18, 8 }
  0x2b   : > { %s1052_s24 = scalar_lea.hbm %s1175_s0, %s596_s28  ;;  %s169_s23 = scalar_lea.vmem [#allocation2], %s578_s22 }
  0x2c   : > { %s176_s27 = sshll.u32 %s169_s23, 4  ;;  %p1056_p8 = pnand %p731_p6, %p37_p9  ;;  %s1054_s27 = int_to_ptr.vmem [resolvable:$true] %s176_s27 }
  0x2d   : > { %s1060_s18 = scalar_lea.sflag [#allocation3], %s165_s15  ;;  %s806_s5 = scalar_lea.hbm %s1052_s24, 256 }
  0x2e   : > { %p807_p10 = scmp.ne.s32.totalorder %s1052_s24, %s806_s5  ;;  %p808_p11 = pneg %p1056_p8 }
  0x2f   : > { %s811_s8 = scalar_lea.hbm %s1175_s0, 1024  ;;  %p812_p0 = scmp.lt.u32.totalorder %s1052_s24, %s1175_s0 }
  0x30   : > { %p809_p12 = pnand %p808_p11, %p807_p10  ;;  %p813_p2 = scmp.lt.u32.totalorder %s811_s8, %s806_s5 }
  0x31   : > { %p815_p7 = scmp.lt.u32.totalorder %s806_s5, %s1052_s24 }
  0x32   : > { %p810_p13 = pneg %p809_p12  ;;  %p814_p3 = por %p813_p2, %p812_p0 }
  0x34   : > { %p816_p1 = por %p815_p7, %p814_p3 }
  0x36   : > { %p817_p4 = pnand %p816_p1, %p810_p13 }
  0x38   : > { %820 = shalt.err (!%p817_p4)
}
  0x39   : > { %s821_s13 = scalar_lea.vmem %s1054_s27, 256  ;;  %s939_s15 = smov [#allocation2]  }
  0x3a   : > { %p822_p5 = scmp.ne.s32.totalorder %s1054_s27, %s821_s13  ;;  %s826_s22 = sshll.u32 %s939_s15, 4  ;;  %s827_s22 = int_to_ptr.vmem [resolvable:$false] %s826_s22 }
  0x3b   : > { %s828_s28 = scalar_lea.vmem %s827_s22, 512  ;;  %p829_p10 = scmp.lt.s32.totalorder %s1054_s27, %s827_s22 }
  0x3c   : > { %p824_p6 = pnand %p822_p5, %p808_p11  ;;  %p830_p12 = scmp.lt.s32.totalorder %s828_s28, %s821_s13 }
  0x3e   : > { %p825_p9 = pneg %p824_p6  ;;  %p831_p0 = por %p830_p12, %p829_p10 }
  0x40   : > { %p832_p2 = pnand %p831_p0, %p825_p9 }
  0x42   : > { %835 = shalt.err (!%p832_p2)
}
  0x43   : > { %729 = dma.hbm_to_vmem [thread:$0]  (!%p1056_p8), %s1052_s24, 256, %s1054_s27, %s1060_s18, %s937_s10, %s937_s10, %s938_s11  }
  0x44   : > { %p1187_p11 = scmp.ne.s32.totalorder %s1184_s21, 0 }
  0x45   : > { %s190_s29 = sand.u32 (!%p1187_p11), 1, %s926_s16   ;;  %p1188_p13 = scmp.ne.s32.totalorder (!%p1187_p11), %s1183_s20, 0 }
  0x46   : > { %188 = sbr.rel (%p1187_p11) target bundleno = 598 (0x256), region = 32  ;;  %s1094_s30 = sshll.u32 (!%p1187_p11), %s190_s29, 4 }
  0x47   : > { %s191_s23 = scalar_lea.sflag (!%p1187_p11), [#allocation3], %s190_s29  ;;  %s194_s5 = scalar_lea.vmem (!%p1187_p11), [#allocation2], %s1094_s30 }
  0x4d   : > { %905 = dma.done.wait (%p1188_p13), %s191_s23, 256  }
  0x4e   : > { %907 = vsyncadd (%p1188_p13), %s191_s23, 4294967040  ;;  %p1189_p3 = scmp.eq.s32.totalorder %s990_s19, 0 }
  0x50   : > { %909 = dma.done.wait (%p1189_p3), [#allocation6], 2048   ;;  %p1190_p8 = pmov %p1189_p3 }
  0x51   : > { %p1191_p7 = scmp.ne.s32.totalorder %s990_s19, 0 }
  0x52   : > { %911 = vsyncadd (%p1190_p8), [#allocation6], 4294965248  ;;  %v940_v0 = vmov (!%p1191_p7), 0.0  }
  0x53   : > { %222 = sbr.rel (%p1191_p7) target bundleno = 90 (0x5a), region = 44  ;;  %223 = vst [vmem:[#allocation7] sm:$0x1] (!%p1191_p7), %v940_v0  ;;  %224 = vst [vmem:[#allocation8] sm:$0x1] (!%p1191_p7), %v940_v0 }
  0x5a PF: > { %v227_v1 = vld [vmem:[#allocation5] sm:$0xff]  ;;  %v228_v2 = vld [vmem:[#allocation5 + $0x8] sm:$0xff]  ;;  %v229_v3 = vld [vmem:[#allocation5 + $0x10] sm:$0xff]  ;;  %v941_v27 = vmov 0.0|0.0   ;;  %vm942_vm0 = vmmov 0   ;;  %v943_v28 = vmov 0.0   ;;  %v325_v29 = vlaneseq }
  0x5b   : > { %v670_v4 = vpack.c.bf16 %v228_v2, %v227_v1  ;;  %v230_v5 = vld [vmem:[#allocation5 + $0x18] sm:$0xff]  ;;  %v231_v7 = vld [vmem:[#allocation5 + $0x20] sm:$0xff]  ;;  %v232_v8 = vld [vmem:[#allocation5 + $0x28] sm:$0xff]  ;;  %702 = vmatprep.subr.bf16.mxu1 %v941_v27  ;;  %660 = vmatprep.mubr.msk.f32.mxu1 %vm942_vm0, %v943_v28  ;;  %s586_s20 = sshll.u32 %s990_s19, 4  ;;  %vm334_vm2 = vcmask 130048   ;;  %s944_s11 = smov [#allocation7]  }
  0x5c   : > { %v674_v6 = vpack.c.bf16 %v230_v5, %v229_v3  ;;  %v678_v9 = vpack.c.bf16 %v232_v8, %v231_v7  ;;  %v225_v10 = vld [vmem:[%s194_s5] sm:$0xff]  ;;  %v234_v12 = vld [vmem:[#allocation5 + $0x38] sm:$0xff]  ;;  %v236_v15 = vld [vmem:[#allocation5 + $0x48] sm:$0xff]  ;;  %v326_v30 = vand.u32 127, %v325_v29  ;;  %v328_v31 = vstv %s586_s20  ;;  %s492_s24 = sshll.u32 %s944_s11, 4  ;;  %p733_p1 = scmp.eq.s32.totalorder %s990_s19, 3  ;;  %s493_s24 = int_to_ptr.vmem [resolvable:$true] %s492_s24 }
  0x5d   : > { %671 = vmatprep.subr.bf16.mxu0 %v670_v4  ;;  %v233_v11 = vld [vmem:[#allocation5 + $0x30] sm:$0xff]  ;;  %653 = vmatprep.mubr.f32.mxu0 %v225_v10  ;;  %v235_v14 = vld [vmem:[#allocation5 + $0x40] sm:$0xff]  ;;  %v238_v18 = vld [vmem:[#allocation5 + $0x58] sm:$0xff]  ;;  %s945_s27 = smov [#allocation8]   ;;  %s836_s18 = scalar_lea.vmem %s493_s24, 16 }
  0x5e   : > { %673 = vmatpush3.bf16.msra.mxu0 %v670_v4  ;;  %v682_v13 = vpack.c.bf16 %v234_v12, %v233_v11  ;;  %v686_v16 = vpack.c.bf16 %v236_v15, %v235_v14  ;;  %v237_v17 = vld [vmem:[#allocation5 + $0x50] sm:$0xff]  ;;  %v239_v20 = vld [vmem:[#allocation5 + $0x60] sm:$0xff]  ;;  %v240_v21 = vld [vmem:[#allocation5 + $0x68] sm:$0xff]  ;;  %v329_v33 = vadd.s32 %v328_v31, %v326_v30  ;;  %s503_s26 = sshll.u32 %s945_s27, 4  ;;  %p837_p4 = scmp.ne.s32.totalorder %s493_s24, %s836_s18  ;;  %s504_s26 = int_to_ptr.vmem [resolvable:$true] %s503_s26 }
  0x5f   : > { %675 = vmatprep.subr.bf16.mxu0 %v674_v6  ;;  %v690_v19 = vpack.c.bf16 %v238_v18, %v237_v17  ;;  %v694_v22 = vpack.c.bf16 %v240_v21, %v239_v20  ;;  %v241_v23 = vld [vmem:[#allocation5 + $0x70] sm:$0xff]  ;;  %v242_v24 = vld [vmem:[#allocation5 + $0x78] sm:$0xff]  ;;  %v585_v32 = vld [vmem:[%s1177_s2] ss:$0 sm:$0xff]  ;;  %s842_s6 = scalar_lea.vmem %s493_s24, 32  ;;  %p843_p9 = scmp.lt.s32.totalorder %s493_s24, %s493_s24 }
  0x60   : > { %v698_v25 = vpack.c.bf16 %v242_v24, %v241_v23  ;;  %v226_v26 = vld [vmem:[%s194_s5 + $0x8] sm:$0xff]  ;;  %vm330_vm1 = vcmp.lt.s32.totalorder %v329_v33, 50  ;;  %v333_v43 = vld [vmem:[#allocation7] sm:$0x1]  ;;  %v410_v47 = vld [vmem:[#allocation8] sm:$0x1]  ;;  %p838_p5 = pnand %p837_p4, %p733_p1  ;;  %p844_p10 = scmp.lt.s32.totalorder %s842_s6, %s836_s18 }
  0x61   : > { %v587_v42 = vsel %vm330_vm1, 1.0, %v943_v28 }
  0x62   : > { %677 = vmatpush3.bf16.msra.mxu0 %v674_v6  ;;  %p839_p6 = pneg %p838_p5  ;;  %p845_p12 = por %p844_p10, %p843_p9 }
  0x63   : > { %679 = vmatprep.subr.bf16.mxu0 %v678_v9 }
  0x64   : > { %p846_p0 = pnand %p845_p12, %p839_p6 }
  0x66   : > { %681 = vmatpush3.bf16.msra.mxu0 %v678_v9 }
  0x67   : > { %683 = vmatprep.subr.bf16.mxu0 %v682_v13 }
  0x6a   : > { %685 = vmatpush3.bf16.msra.mxu0 %v682_v13 }
  0x6b   : > { %687 = vmatprep.subr.bf16.mxu0 %v686_v16 }
  0x6e   : > { %689 = vmatpush3.bf16.msra.mxu0 %v686_v16 }
  0x6f   : > { %691 = vmatprep.subr.bf16.mxu0 %v690_v19 }
  0x72   : > { %693 = vmatpush3.bf16.msra.mxu0 %v690_v19 }
  0x73   : > { %695 = vmatprep.subr.bf16.mxu0 %v694_v22 }
  0x76   : > { %697 = vmatpush3.bf16.msra.mxu0 %v694_v22 }
  0x77   : > { %699 = vmatprep.subr.bf16.mxu0 %v698_v25 }
  0x7a   : > { %701 = vmatpush3.bf16.msra.mxu0 %v698_v25 }
  0x7d   : > { %654 = vmatmul.mubr.f32.vlgmr.msra.gmra.mrb[0].mxu0 %v226_v26 }
 0x150   : > { %v655_v34 = vpop.f32.mrb[0].mxu0 }
 0x151   : > { %v322_v35 = vadd.f32 %v655_v34, %v585_v32  ;;  %v316_v36 = vpop.f32.mrb[1].mxu0 }
 0x152   : > { %v317_v37 = vadd.f32 %v585_v32, %v316_v36 }
 0x153   : > { %v412_v38 = vmul.f32 %v322_v35, %v322_v35 }
 0x154   : > { %v411_v39 = vmul.f32 %v317_v37, %v317_v37  ;;  %v703_v40 = vpack.c.bf16 %v322_v35, %v317_v37 }
 0x156   : > { %v706_v41 = vpack.c.bf16 %v412_v38, %v411_v39  ;;  %704 = vmatpush3.bf16.msra.mxu1 %v703_v40 }
 0x157   : > { %705 = vmatprep.subr.bf16.mxu1 %v941_v27 }
 0x159   : > { %661 = vmatmul.mubr.msk.f32.vlgmr.msra.gmra.mrb[0].mxu1 %vm334_vm2, %v587_v42 }
 0x15a   : > { %707 = vmatpush3.bf16.msra.mxu1 %v706_v41  ;;  %667 = vmatprep.mubr.msk.f32.mxu1 %vm942_vm0, %v943_v28 }
 0x15d   : > { %668 = vmatmul.mubr.msk.f32.vlgmr.msra.gmra.mrb[2].mxu1 %vm334_vm2, %v587_v42 }
 0x22c   : > { %v404_v44 = vpop.f32.mrb[0].mxu1 }
 0x22d   : > { %v408_v45 = vadd.f32 %v404_v44, %v333_v43  ;;  %v662_v46 = vpop.f32.mrb[1].mxu1 }
 0x22f   : > { %409 = vst [vmem:[#allocation7] sm:$0x1] %v408_v45 }
 0x230   : > { %v479_v48 = vpop.f32.mrb[2].mxu1 }
 0x231   : > { %849 = shalt.err (!%p846_p0)
}
 0x232   : > { %s850_s9 = scalar_lea.hbm %s1178_s3, 16 }
 0x233   : > { %p851_p2 = scmp.ne.s32.totalorder %s1178_s3, %s850_s9  ;;  %p856_p3 = scmp.lt.u32.totalorder %s850_s9, %s1178_s3 }
 0x235   : > { %p852_p11 = pnand %p851_p2, %p733_p1 }
 0x237   : > { %p853_p13 = pneg %p852_p11 }
 0x239   : > { %p858_p8 = pnand %p856_p3, %p853_p13 }
 0x23b   : > { %861 = shalt.err (!%p858_p8)
}
 0x23c   : > { %715 = dma.vmem_to_hbm [thread:$0]  (%p733_p1), %s493_s24, 16, %s1178_s3, [#allocation4]   ;;  %v483_v49 = vadd.f32 %v479_v48, %v410_v47  ;;  %v669_v50 = vpop.f32.mrb[3].mxu1 }
 0x23d   : > { %s862_s30 = scalar_lea.vmem %s504_s26, 16  ;;  %s868_s23 = scalar_lea.vmem %s504_s26, 32 }
 0x23e   : > { %484 = vst [vmem:[#allocation8] sm:$0x1] %v483_v49  ;;  %p863_p7 = scmp.ne.s32.totalorder %s504_s26, %s862_s30  ;;  %p869_p6 = scmp.lt.s32.totalorder %s504_s26, %s504_s26 }
 0x23f   : > { %p870_p9 = scmp.lt.s32.totalorder %s868_s23, %s862_s30 }
 0x240   : > { %p864_p4 = pnand %p863_p7, %p733_p1 }
 0x241   : > { %p871_p10 = por %p870_p9, %p869_p6 }
 0x242   : > { %p865_p5 = pneg %p864_p4 }
 0x244   : > { %p872_p12 = pnand %p871_p10, %p865_p5 }
 0x246   : > { %875 = shalt.err (!%p872_p12)
}
 0x247   : > { %s876_s21 = scalar_lea.hbm %s1179_s4, 16 }
 0x248   : > { %p877_p0 = scmp.ne.s32.totalorder %s1179_s4, %s876_s21  ;;  %p882_p13 = scmp.lt.u32.totalorder %s876_s21, %s1179_s4 }
 0x24a   : > { %p878_p2 = pnand %p877_p0, %p733_p1 }
 0x24c   : > { %p879_p11 = pneg %p878_p2 }
 0x24e   : > { %p884_p3 = pnand %p882_p13, %p879_p11 }
 0x250   : > { %887 = shalt.err (!%p884_p3)
}
 0x251   : > { %717 = dma.vmem_to_hbm [thread:$0]  (%p733_p1), %s504_s26, 16, %s1179_s4, [#allocation9]  }
 0x252   : > { %913 = dma.done.wait (%p733_p1), [#allocation4], 16  }
 0x253   : > { %915 = vsyncadd (%p733_p1), [#allocation4], 4294967280 }
 0x254   : > { %917 = dma.done.wait (%p733_p1), [#allocation9], 16  }
 0x255   : > { %919 = vsyncadd (%p733_p1), [#allocation9], 4294967280 }
 0x256 PF: > { %p18_p8 = scmp.ge.s32.totalorder %s1016_s25, 6   ;;  %s1192_s15 = smov %s926_s16 }
 0x257   : > { %s1193_s16 = smov %s930_s17  ;;  %s1194_s17 = smov %s1045_s14 }
 0x258   : > { %s1195_s18 = smov %s1016_s25  ;;  %20 = sbr.rel (!%p18_p8) target bundleno = 6 (0x6), region = 85 }
 0x25f   :  { %520 = vsyncpa [#allocation3], 1 }
 0x260   :  { %522 = vsyncpa [#allocation3 + $0x1], 1 }
 0x261   :  { %523 = vsyncpa [#allocation6], 1 }
 0x262   :  { %524 = vsyncpa [#allocation4], 1 }
 0x263   :  { %526 = vsyncpa [#allocation4 + $0x1], 1 }
 0x264   :  { %527 = vsyncpa [#allocation9], 1 }

</bundles_post_ra>
